<compile_context>
chip_gen: v5e
topology: v5e:2x2
jax: 0.10.0
libtpu: 0.0.40
codegen_flags: <defaults>
</compile_context>

<pallas_src>
import jax
import jax.numpy as jnp
from jax.experimental import pallas as pl
from jax.experimental.pallas import tpu as pltpu


def _round_up(x, m):
    return ((x + m - 1) // m) * m


def _pick_tile(padded, base, cap):
    """Largest multiple of `base` that divides `padded` (itself a multiple of
    `base`) and is <= cap."""
    m = padded // base
    max_mult = max(cap // base, 1)
    best = 1
    for d in range(1, min(m, max_mult) + 1):
        if m % d == 0:
            best = d
    return best * base


def _linear_kernel_f32(x_ref, w_ref, b_ref, o_ref):
    # f32 output: accumulate directly into the resident output block (no scratch).
    k = pl.program_id(2)

    @pl.when(k == 0)
    def _():
        o_ref[...] = jnp.zeros_like(o_ref)

    o_ref[...] += jnp.dot(x_ref[...], w_ref[...],
                          preferred_element_type=jnp.float32)

    @pl.when(k == pl.num_programs(2) - 1)
    def _():
        # (1, tn) bias broadcasts over the tm rows; added exactly once.
        o_ref[...] += b_ref[...]


def _linear_kernel_acc(x_ref, w_ref, b_ref, o_ref, acc_ref):
    # Low-precision output: keep an f32 VMEM accumulator, cast once at the end.
    k = pl.program_id(2)

    @pl.when(k == 0)
    def _():
        acc_ref[...] = jnp.zeros_like(acc_ref)

    acc_ref[...] += jnp.dot(x_ref[...], w_ref[...],
                            preferred_element_type=jnp.float32)

    @pl.when(k == pl.num_programs(2) - 1)
    def _():
        o_ref[...] = (acc_ref[...] + b_ref[...]).astype(o_ref.dtype)


def linear_forward(x, weight_t, bias):
    """x: (B, Din), weight_t: (Din, Dout), bias: (1, Dout) -> (B, Dout)."""
    B, Din = x.shape
    Dout = weight_t.shape[1]

    # Tiny-shape fast path: pure fixed cost in the kernel, XLA fused dot+add wins.
    if Din < 128 and Dout < 128:
        return x @ weight_t + bias

    # Pad only to hardware granularity (sublane 8, lane 128) — not to tile size.
    Mp = _round_up(B, 8)
    Kp = _round_up(Din, 128)
    Np = _round_up(Dout, 128)

    # Tiles: largest divisors of the padded sizes, capped at 512.
    tm = _pick_tile(Mp, 8, 512)
    tn = _pick_tile(Np, 128, 512)
    tk = _pick_tile(Kp, 128, 512)

    # v7x has 2 TensorCores: make sure the parallel (M, N) grid has >= 2 tiles
    # so dimension_semantics=("parallel", "parallel", ...) can shard the work.
    if (Mp // tm) * (Np // tn) == 1:
        if Mp // 8 >= 2:
            tm = _pick_tile(Mp, 8, max(tm // 2, 8))
        elif Np // 128 >= 2:
            tn = _pick_tile(Np, 128, max(tn // 2, 128))

    # Zero-pad ragged edges (zeros contribute nothing to the dot). With the
    # granularity-only padding above this is often a no-op.
    xp = x if (Mp == B and Kp == Din) else jnp.pad(x, ((0, Mp - B), (0, Kp - Din)))
    wp = (weight_t if (Kp == Din and Np == Dout)
          else jnp.pad(weight_t, ((0, Kp - Din), (0, Np - Dout))))
    bp = bias if Np == Dout else jnp.pad(bias, ((0, 0), (0, Np - Dout)))

    grid = (Mp // tm, Np // tn, Kp // tk)

    use_f32_path = xp.dtype == jnp.float32
    kernel = _linear_kernel_f32 if use_f32_path else _linear_kernel_acc
    scratch = [] if use_f32_path else [pltpu.VMEM((tm, tn), jnp.float32)]

    out = pl.pallas_call(
        kernel,
        out_shape=jax.ShapeDtypeStruct((Mp, Np), x.dtype),
        grid=grid,
        in_specs=[
            pl.BlockSpec((tm, tk), lambda i, j, k: (i, k)),
            pl.BlockSpec((tk, tn), lambda i, j, k: (k, j)),
            pl.BlockSpec((1, tn), lambda i, j, k: (0, j)),
        ],
        out_specs=pl.BlockSpec((tm, tn), lambda i, j, k: (i, j)),
        scratch_shapes=scratch,
        compiler_params=pltpu.CompilerParams(
            dimension_semantics=("parallel", "parallel", "arbitrary")),
    )(xp, wp, bp)

    if Mp == B and Np == Dout:
        return out
    return out[:B, :Dout]


def init_params(key, input_dim, output_dim):
    """Deterministic init mimicking PyTorch nn.Linear default (uniform +-1/sqrt(fan_in))."""
    kw, kb = jax.random.split(key)
    bound = 1.0 / jnp.sqrt(jnp.maximum(input_dim, 1)).astype(jnp.float32)
    # PyTorch stores weight as (out, in); we keep the transposed (in, out) layout.
    w_t = jax.random.uniform(kw, (input_dim, output_dim),
                             minval=-bound, maxval=bound, dtype=jnp.float32)
    b = jax.random.uniform(kb, (1, output_dim),
                           minval=-bound, maxval=bound, dtype=jnp.float32)
    return w_t, b


if __name__ == "__main__":
    key = jax.random.PRNGKey(0)

    # Case 1: module defaults (input_dim=1, output_dim=1) -> tiny-shape fast path.
    k1, k2, key = jax.random.split(key, 3)
    x_small = jax.random.normal(k1, (8, 1), dtype=jnp.float32)
    w_small, b_small = init_params(k2, 1, 1)
    y_small = linear_forward(x_small, w_small, b_small)
    jax.block_until_ready(y_small)
    ref_small = x_small @ w_small + b_small
    assert y_small.shape == (8, 1)
    assert jnp.allclose(y_small, ref_small, atol=1e-5), "small-shape mismatch vs reference"

    # Case 2: ragged shape exercising the Pallas path (padding, M-split for 2 TCs,
    # K accumulation directly into the resident output block).
    k3, k4 = jax.random.split(key)
    B, Din, Dout = 192, 384, 160
    x_big = jax.random.normal(k3, (B, Din), dtype=jnp.float32)
    w_big, b_big = init_params(k4, Din, Dout)
    y_big = linear_forward(x_big, w_big, b_big)
    jax.block_until_ready(y_big)
    ref_big = x_big @ w_big + b_big
    assert y_big.shape == (B, Dout)
    assert jnp.allclose(y_big, ref_big, atol=1e-4, rtol=1e-5), "big-shape mismatch vs reference"

    print("KERNEL_OK")
</pallas_src>

<mosaic_0001>
module attributes {stable_mosaic.version = 11 : i64} {
  func.func @_linear_kernel_f32(%arg0: i32, %arg1: i32, %arg2: i32, %arg3: memref<96x384xf32, #tpu.memory_space<vmem>>, %arg4: memref<384x256xf32, #tpu.memory_space<vmem>>, %arg5: memref<1x256xf32, #tpu.memory_space<vmem>>, %arg6: memref<96x256xf32, #tpu.memory_space<vmem>>) attributes {dimension_semantics = [#tpu.dimension_semantics<parallel>, #tpu.dimension_semantics<parallel>, #tpu.dimension_semantics<arbitrary>], iteration_bounds = array<i64: 2, 1, 1>, scalar_prefetch = 0 : i64, scratch_operands = 0 : i64, tpu.core_type = #tpu.core_type<tc>, window_params = [{transform_indices = @transform_0, window_bounds = array<i64: 96, 384>}, {transform_indices = @transform_1, window_bounds = array<i64: 384, 256>}, {transform_indices = @transform_2, window_bounds = array<i64: 1, 256>}, {transform_indices = @transform_3, window_bounds = array<i64: 96, 256>}]} {
    %c0_i32 = arith.constant 0 : i32
    %0 = arith.cmpi eq, %arg2, %c0_i32 : i32
    %1 = arith.extui %0 : i1 to i32
    %c0_i32_0 = arith.constant 0 : i32
    %2 = arith.cmpi ne, %1, %c0_i32_0 : i32
    scf.if %2 {
      %cst_10 = arith.constant 0.000000e+00 : f32
      %12 = vector.broadcast %cst_10 : f32 to vector<96x256xf32>
      %c0_11 = arith.constant 0 : index
      %c0_12 = arith.constant 0 : index
      %13 = vector.load %arg6[%c0_11, %c0_12] : memref<96x256xf32, #tpu.memory_space<vmem>>, vector<96x256xf32>
      tpu.vector_store %arg6[%c0_11, %c0_12], %12 {strides = array<i32>} : memref<96x256xf32, #tpu.memory_space<vmem>>, vector<96x256xf32>,
    } else {
    }
    %c0 = arith.constant 0 : index
    %c0_1 = arith.constant 0 : index
    %3 = vector.load %arg6[%c0, %c0_1] : memref<96x256xf32, #tpu.memory_space<vmem>>, vector<96x256xf32>
    %c0_2 = arith.constant 0 : index
    %c0_3 = arith.constant 0 : index
    %4 = vector.load %arg3[%c0_2, %c0_3] : memref<96x384xf32, #tpu.memory_space<vmem>>, vector<96x384xf32>
    %c0_4 = arith.constant 0 : index
    %c0_5 = arith.constant 0 : index
    %5 = vector.load %arg4[%c0_4, %c0_5] : memref<384x256xf32, #tpu.memory_space<vmem>>, vector<384x256xf32>
    %cst = arith.constant dense<0.000000e+00> : vector<96x256xf32>
    %6 = tpu.matmul %4, %5, %cst {dimension_numbers = #tpu.dot_dimension_numbers<[1], [0], [0], [1], [0, 0, 1, 1], [], []>} : vector<96x384xf32>, vector<384x256xf32>, vector<96x256xf32> -> vector<96x256xf32>
    %7 = arith.addf %3, %6 : vector<96x256xf32>
    %c0_6 = arith.constant 0 : index
    %c0_7 = arith.constant 0 : index
    %8 = vector.load %arg6[%c0_6, %c0_7] : memref<96x256xf32, #tpu.memory_space<vmem>>, vector<96x256xf32>
    tpu.vector_store %arg6[%c0_6, %c0_7], %7 {strides = array<i32>} : memref<96x256xf32, #tpu.memory_space<vmem>>, vector<96x256xf32>,
    %c0_i32_8 = arith.constant 0 : i32
    %9 = arith.cmpi eq, %arg2, %c0_i32_8 : i32
    %10 = arith.extui %9 : i1 to i32
    %c0_i32_9 = arith.constant 0 : i32
    %11 = arith.cmpi ne, %10, %c0_i32_9 : i32
    scf.if %11 {
      %c0_10 = arith.constant 0 : index
      %c0_11 = arith.constant 0 : index
      %12 = vector.load %arg6[%c0_10, %c0_11] : memref<96x256xf32, #tpu.memory_space<vmem>>, vector<96x256xf32>
      %c0_12 = arith.constant 0 : index
      %c0_13 = arith.constant 0 : index
      %13 = vector.load %arg5[%c0_12, %c0_13] : memref<1x256xf32, #tpu.memory_space<vmem>>, vector<1x256xf32>
      %14 = vector.broadcast %13 : vector<1x256xf32> to vector<96x256xf32>
      %15 = arith.addf %12, %14 : vector<96x256xf32>
      %c0_14 = arith.constant 0 : index
      %c0_15 = arith.constant 0 : index
      %16 = vector.load %arg6[%c0_14, %c0_15] : memref<96x256xf32, #tpu.memory_space<vmem>>, vector<96x256xf32>
      tpu.vector_store %arg6[%c0_14, %c0_15], %15 {strides = array<i32>} : memref<96x256xf32, #tpu.memory_space<vmem>>, vector<96x256xf32>,
    } else {
    }
    return
  }
  func.func @transform_0(%arg0: i32, %arg1: i32, %arg2: i32) -> (i32, i32) {
    %c0_i32 = arith.constant 0 : i32
    return %arg0, %arg2 : i32, i32
  }
  func.func @transform_1(%arg0: i32, %arg1: i32, %arg2: i32) -> (i32, i32) {
    %c0_i32 = arith.constant 0 : i32
    return %arg2, %arg1 : i32, i32
  }
  func.func @transform_2(%arg0: i32, %arg1: i32, %arg2: i32) -> (i32, i32) {
    %c0_i32 = arith.constant 0 : i32
    %c0_i32_0 = arith.constant 0 : i32
    return %c0_i32, %arg1 : i32, i32
  }
  func.func @transform_3(%arg0: i32, %arg1: i32, %arg2: i32) -> (i32, i32) {
    %c0_i32 = arith.constant 0 : i32
    return %arg0, %arg1 : i32, i32
  }
}

</mosaic_0001>

<bundles_post_ra>
// kernel: tpu_custom_call.1
= control target key start
LH: loop header
LB: loop body
LE: loop exit
PB: predicated region body
PF: predicated region fallthrough
CT: control target
= control target key end

     0   :  { %8 = vsyncpa [#allocation3], 0  ;;  %s1743_s0 = inlined_call_operand.hbm [shape: f32[192,384], index: 0, kind: input, shape index: {}]   ;;  %s1744_s1 = inlined_call_operand.hbm [shape: f32[384,256], index: 1, kind: input, shape index: {}]   ;;  %s1745_s2 = inlined_call_operand.hbm [shape: f32[1,256], index: 2, kind: input, shape index: {}]   ;;  %s1746_s3 = inlined_call_operand.hbm [shape: f32[192,256], index: 3, kind: output, shape index: {}]  }
   0x1   :  { %10 = vsyncpa [#allocation3 + $0x1], 0 }
   0x2   :  { %11 = vsyncpa [#allocation6], 0 }
   0x3   :  { %12 = vsyncpa [#allocation4], 0 }
   0x4   :  { %14 = vsyncpa [#allocation4 + $0x1], 0  ;;  %s1391_s12 = smov 0   ;;  %s1393_s13 = smov 0  }
   0x5   :  { %s1395_s14 = smov 0   ;;  %s1397_s15 = smov 0  }
   0x6   :  { %s1399_s16 = smov 0   ;;  %s1401_s17 = smov 0  }
   0x7 LB: > { %s1041_s18 = sadd.s32 4294967295, %s1361_s17   ;;  %s1042_s19 = sadd.s32 4294967294, %s1361_s17   ;;  %s1361_s17 = sphi %s1401_s17, %s20_s17   ;;  %s1357_s16 = sphi %s1399_s16, %s1757_s16   ;;  %s1353_s15 = sphi %s1397_s15, %s1756_s15   ;;  %s1349_s14 = sphi %s1395_s14, %s1755_s14   ;;  %s1345_s13 = sphi %s1393_s13, %s1754_s13   ;;  %s1341_s12 = sphi %s1391_s12, %s1753_s12  }
   0x8   : > { %p61_p0 = scmp.ne.s32.totalorder %s1345_s13, %s1341_s12  ;;  %p1425_p1 = scmp.eq.s32.totalorder %s1041_s18, 0 }
   0x9   : > { %p1429_p2 = scmp.eq.s32.totalorder %s1041_s18, 1  ;;  %p147_p3 = scmp.eq.s32.totalorder %s1042_s19, 1 }
   0xa   : > { %p1435_p4 = por %p1425_p1, %p61_p0  ;;  %p1043_p5 = scmp.ge.s32.totalorder %s1361_s17, 1 }
   0xb   : > { %p1440_p6 = por %p147_p3, %p61_p0  ;;  %p154_p7 = scmp.lt.s32.totalorder %s1361_s17, 3 }
   0xc   : > { %s171_s26 = sshll.u32 %s1744_s1, 4  ;;  %s1363_s28 = smov [#allocation5]   ;;  %s172_s26 = int_to_ptr.hbm [resolvable:$true] %s171_s26 }
   0xd   : > { %p1448_p8 = pnand %p1043_p5, %p154_p7  ;;  %s173_s29 = sshll.u32 %s1363_s28, 4  ;;  %s174_s29 = int_to_ptr.vmem [resolvable:$true] %s173_s29 }
   0xe   : > { %p1046_p11 = scmp.ge.s32.totalorder %s1361_s17, 2  ;;  %s188_s5 = sshll.u32 %s1745_s2, 4  ;;  %s189_s5 = int_to_ptr.hbm [resolvable:$true] %s188_s5 }
   0xf   : > { %p1106_p9 = pneg %p1448_p8  ;;  %s1364_s6 = smov 256  }
  0x10   : > { %s1365_s7 = smov 16   ;;  %s1366_s8 = smov [#allocation7]  }
  0x11   : > { %p1107_p10 = pnand %p1106_p9, %p1425_p1  ;;  %s190_s9 = sshll.u32 %s1366_s8, 4  ;;  %s191_s9 = int_to_ptr.vmem [resolvable:$true] %s190_s9 }
  0x12   : > { %s39_s10 = sadd.s32 1, %s1357_s16  ;;  %s48_s11 = sadd.s32 1, %s1349_s14 }
  0x13   : > { %1109 = dma.hbm_to_vmem [thread:$0]  (!%p1107_p10), %s172_s26, 12288, %s174_s29, [#allocation6], %s1364_s6, %s1364_s6, %s1365_s7  }
  0x14   : > { %1112 = dma.hbm_to_vmem [thread:$0]  (!%p1107_p10), %s189_s5, 32, %s191_s9, [#allocation6]  }
  0x15   : > { %p41_p12 = scmp.ge.s32.totalorder %s39_s10, 2  ;;  %p55_p13 = scmp.ne.s32.totalorder %s1349_s14, %s1345_s13 }
  0x16   : > { %p56_p0 = scmp.eq.s32.totalorder %s1361_s17, 0  ;;  %p1123_p3 = scmp.lt.s32.totalorder %s1361_s17, 2 }
  0x17   : > { %s1759_s10 = smov (%p41_p12, %s39_s10), 0  ;;  %p1470_p7 = por %p1429_p2, %p55_p13 }
  0x18   : > { %p57_p5 = por %p56_p0, %p55_p13  ;;  %s43_s19 = ssub.s32 %s1357_s16, %s1759_s10 }
  0x19   : > { %s201_s24 = sand.u32 1, %s1349_s14   ;;  %p46_p9 = scmp.eq.s32.totalorder %s43_s19, 0 }
  0x1a   : > { %s1090_s25 = smul.u32 288, %s201_s24  ;;  %p1114_p10 = pnand %p1123_p3, %p57_p5 }
  0x1b   : > { %s1478_s26 = scalar_select %p46_p9, %s1349_s14, %s48_s11  }
  0x1c   : > { %s1124_s28 = smul.u32 288, %s1357_s16  ;;  %s205_s29 = scalar_lea.vmem [#allocation2], %s1090_s25 }
  0x1d   : > { %s216_s30 = sshll.u32 %s205_s29, 4  ;;  %s202_s7 = scalar_lea.sflag [#allocation3], %s201_s24  ;;  %s217_s30 = int_to_ptr.vmem [resolvable:$true] %s216_s30 }
  0x1e   : > { %s213_s6 = scalar_lea.hbm %s1743_s0, %s1124_s28  ;;  %s1367_s8 = smov 384  }
  0x1f   : > { %s214_s21 = sshll.u32 %s213_s6, 4  ;;  %s1368_s9 = smov 24   ;;  %s215_s21 = int_to_ptr.hbm [resolvable:$true] %s214_s21 }
  0x20   : > { %1116 = dma.hbm_to_vmem [thread:$0]  (!%p1114_p10), %s215_s21, 4608, %s217_s30, %s202_s7, %s1367_s8, %s1367_s8, %s1368_s9  }
  0x21   : > { %228 = sbr.rel (%p1448_p8) target bundleno = 352 (0x160), region = 32  ;;  %s1487_s11 = sand.u32 (!%p1448_p8), 1, %s1345_s13  }
  0x22   : > { %s1092_s19 = smul.u32 (!%p1448_p8), 288, %s1487_s11  ;;  %s231_s25 = scalar_lea.sflag (!%p1448_p8), [#allocation3], %s1487_s11 }
  0x24   : > { %s1491_s29 = scalar_lea.vmem (!%p1448_p8), [#allocation2], %s1092_s19 }
  0x26   : > { %1328 = dma.done.wait (%p1435_p4), %s231_s25, 4608  }
  0x27   : > { %1330 = vsyncadd (%p1435_p4), %s231_s25, 4294962688 }
  0x28   : > { %1332 = dma.done.wait (%p1425_p1), [#allocation6], 12320  }
  0x29   : > { %1334 = vsyncadd (%p1425_p1), [#allocation6], 4294954976  ;;  %v393_v0 = vld [vmem:[#allocation5 + $0xf0] sm:$0xff]  ;;  %v391_v2 = vld [vmem:[#allocation5 + $0xe0] sm:$0xff]  ;;  %s1093_s20 = smul.u32 192, %s1487_s11  ;;  %s907_s5 = scalar_lea.sflag [#allocation4], %s1487_s11 }
  0x2a   : > { %v425_v1 = vld [vmem:[#allocation5 + $0x1f0] sm:$0xff]  ;;  %1058 = vmatpush.msra.mxu2 %v393_v0  ;;  %v423_v3 = vld [vmem:[#allocation5 + $0x1e0] sm:$0xff]  ;;  %459 = vmatpush.msra.mxu0 %v393_v0  ;;  %v1505_v33 = vld [vmem:[%s1491_s29 + $0x98] sm:$0xff]  ;;  %s1057_s27 = smul.u32 192, %s1353_s15  ;;  %s1295_s9 = scalar_lea.hbm %s1746_s3, 384 }
  0x2b   : > { %1074 = vmatpush.msra.mxu3 %v425_v1  ;;  %v389_v4 = vld [vmem:[#allocation5 + $0xd0] sm:$0xff]  ;;  %512 = vmatpush.msra.mxu1 %v425_v1  ;;  %v387_v6 = vld [vmem:[#allocation5 + $0xc0] sm:$0xff]  ;;  %v394_v34 = vld [vmem:[#allocation5 + $0xf8] sm:$0xff]  ;;  %s1647_s22 = scalar_lea.vmem [#allocation8], %s1093_s20 }
  0x2c   : > { %v421_v5 = vld [vmem:[#allocation5 + $0x1d0] sm:$0xff]  ;;  %1059 = vmatpush.msra.mxu2 %v391_v2  ;;  %v419_v7 = vld [vmem:[#allocation5 + $0x1c0] sm:$0xff]  ;;  %460 = vmatpush.msra.mxu0 %v391_v2  ;;  %v392_v36 = vld [vmem:[#allocation5 + $0xe8] sm:$0xff]  ;;  %s921_s30 = scalar_lea.hbm %s1746_s3, %s1057_s27  ;;  %s922_s15 = sshll.u32 %s1647_s22, 4  ;;  %s923_s15 = int_to_ptr.vmem [resolvable:$true] %s922_s15 }
  0x2d   : > { %1075 = vmatpush.msra.mxu3 %v423_v3  ;;  %513 = vmatpush.msra.mxu1 %v423_v3  ;;  %v385_v8 = vld [vmem:[#allocation5 + $0xb0] sm:$0xff]  ;;  %v383_v10 = vld [vmem:[#allocation5 + $0xa0] sm:$0xff]  ;;  %v1513_v39 = vld [vmem:[%s1491_s29 + $0x8] sm:$0xff]  ;;  %s924_s4 = sshll.u32 %s921_s30, 4  ;;  %s925_s4 = int_to_ptr.hbm [resolvable:$true] %s924_s4 }
  0x2e   : > { %1060 = vmatpush.msra.mxu2 %v389_v4  ;;  %v417_v9 = vld [vmem:[#allocation5 + $0x1b0] sm:$0xff]  ;;  %461 = vmatpush.msra.mxu0 %v389_v4  ;;  %v415_v11 = vld [vmem:[#allocation5 + $0x1a0] sm:$0xff]  ;;  %v390_v40 = vld [vmem:[#allocation5 + $0xd8] sm:$0xff]  ;;  %s1289_s6 = sshra.s32 %s925_s4, 4  ;;  %s1290_s6 = int_to_ptr.hbm [resolvable:$true] %s1289_s6 }
  0x2f   : > { %1076 = vmatpush.msra.mxu3 %v421_v5  ;;  %514 = vmatpush.msra.mxu1 %v421_v5  ;;  %v381_v12 = vld [vmem:[#allocation5 + $0x90] sm:$0xff]  ;;  %v379_v14 = vld [vmem:[#allocation5 + $0x80] sm:$0xff]  ;;  %v426_v41 = vld [vmem:[#allocation5 + $0x1f8] sm:$0xff]  ;;  %s1291_s21 = scalar_lea.hbm %s1290_s6, 192  ;;  %p1296_p8 = scmp.lt.s32.totalorder %s1290_s6, %s1746_s3 }
  0x30   : > { %1061 = vmatpush.msra.mxu2 %v387_v6  ;;  %462 = vmatpush.msra.mxu0 %v387_v6  ;;  %v413_v13 = vld [vmem:[#allocation5 + $0x190] sm:$0xff]  ;;  %v411_v15 = vld [vmem:[#allocation5 + $0x180] sm:$0xff]  ;;  %v458_v43 = vld [vmem:[#allocation5 + $0x2f8] sm:$0xff]  ;;  %p1292_p1 = scmp.ne.s32.totalorder %s1290_s6, %s1291_s21  ;;  %p1297_p12 = scmp.lt.s32.totalorder %s1295_s9, %s1291_s21 }
  0x31   : > { %1077 = vmatpush.msra.mxu3 %v419_v7  ;;  %515 = vmatpush.msra.mxu1 %v419_v7  ;;  %v377_v16 = vld [vmem:[#allocation5 + $0x70] sm:$0xff]  ;;  %v375_v18 = vld [vmem:[#allocation5 + $0x60] sm:$0xff]  ;;  %v388_v44 = vld [vmem:[#allocation5 + $0xc8] sm:$0xff] }
  0x32   : > { %1062 = vmatpush.msra.mxu2 %v385_v8  ;;  %463 = vmatpush.msra.mxu0 %v385_v8  ;;  %v409_v17 = vld [vmem:[#allocation5 + $0x170] sm:$0xff]  ;;  %v407_v19 = vld [vmem:[#allocation5 + $0x160] sm:$0xff]  ;;  %v424_v45 = vld [vmem:[#allocation5 + $0x1e8] sm:$0xff]  ;;  %p1293_p2 = pnand %p1292_p1, %p1470_p7  ;;  %p1298_p13 = por %p1297_p12, %p1296_p8 }
  0x33   : > { %1078 = vmatpush.msra.mxu3 %v417_v9  ;;  %516 = vmatpush.msra.mxu1 %v417_v9  ;;  %v373_v20 = vld [vmem:[#allocation5 + $0x50] sm:$0xff]  ;;  %v371_v22 = vld [vmem:[#allocation5 + $0x40] sm:$0xff]  ;;  %v1518_v46 = vld [vmem:[%s1491_s29 + $0xa8] sm:$0xff] }
  0x34   : > { %1063 = vmatpush.msra.mxu2 %v383_v10  ;;  %464 = vmatpush.msra.mxu0 %v383_v10  ;;  %v405_v21 = vld [vmem:[#allocation5 + $0x150] sm:$0xff]  ;;  %v403_v23 = vld [vmem:[#allocation5 + $0x140] sm:$0xff]  ;;  %v456_v49 = vld [vmem:[#allocation5 + $0x2e8] sm:$0xff]  ;;  %p1294_p4 = pneg %p1293_p2 }
  0x35   : > { %1079 = vmatpush.msra.mxu3 %v415_v11  ;;  %517 = vmatpush.msra.mxu1 %v415_v11  ;;  %v369_v24 = vld [vmem:[#allocation5 + $0x30] sm:$0xff]  ;;  %v367_v26 = vld [vmem:[#allocation5 + $0x20] sm:$0xff]  ;;  %v386_v50 = vld [vmem:[#allocation5 + $0xb8] sm:$0xff] }
  0x36   : > { %1064 = vmatpush.msra.mxu2 %v381_v12  ;;  %465 = vmatpush.msra.mxu0 %v381_v12  ;;  %v401_v25 = vld [vmem:[#allocation5 + $0x130] sm:$0xff]  ;;  %v399_v27 = vld [vmem:[#allocation5 + $0x120] sm:$0xff]  ;;  %v422_v51 = vld [vmem:[#allocation5 + $0x1d8] sm:$0xff]  ;;  %p1299_p0 = pnand %p1298_p13, %p1294_p4 }
  0x37   : > { %1080 = vmatpush.msra.mxu3 %v413_v13  ;;  %518 = vmatpush.msra.mxu1 %v413_v13  ;;  %v365_v28 = vld [vmem:[#allocation5 + $0x10] sm:$0xff]  ;;  %v363_v30 = vld [vmem:[#allocation5] sm:$0xff]  ;;  %v454_v53 = vld [vmem:[#allocation5 + $0x2d8] sm:$0xff] }
  0x38   : > { %1065 = vmatpush.msra.mxu2 %v379_v14  ;;  %466 = vmatpush.msra.mxu0 %v379_v14  ;;  %v397_v29 = vld [vmem:[#allocation5 + $0x110] sm:$0xff]  ;;  %v395_v31 = vld [vmem:[#allocation5 + $0x100] sm:$0xff]  ;;  %v1526_v54 = vld [vmem:[%s1491_s29 + $0x18] sm:$0xff] }
  0x39   : > { %1081 = vmatpush.msra.mxu3 %v411_v15  ;;  %519 = vmatpush.msra.mxu1 %v411_v15  ;;  %v1502_v32 = vld [vmem:[%s1491_s29 + $0x90] sm:$0xff]  ;;  %v455_v37 = vld [vmem:[#allocation5 + $0x2e0] sm:$0xff]  ;;  %v384_v56 = vld [vmem:[#allocation5 + $0xa8] sm:$0xff] }
  0x3a   : > { %1066 = vmatpush.msra.mxu2 %v377_v16  ;;  %467 = vmatpush.msra.mxu0 %v377_v16  ;;  %v457_v35 = vld [vmem:[#allocation5 + $0x2f0] sm:$0xff]  ;;  %v1510_v38 = vld [vmem:[%s1491_s29] sm:$0xff]  ;;  %v420_v57 = vld [vmem:[#allocation5 + $0x1c8] sm:$0xff] }
  0x3b   : > { %1082 = vmatpush.msra.mxu3 %v409_v17  ;;  %520 = vmatpush.msra.mxu1 %v409_v17  ;;  %v453_v42 = vld [vmem:[#allocation5 + $0x2d0] sm:$0xff]  ;;  %v451_v48 = vld [vmem:[#allocation5 + $0x2c0] sm:$0xff]  ;;  %v452_v59 = vld [vmem:[#allocation5 + $0x2c8] sm:$0xff] }
  0x3c   : > { %1067 = vmatpush.msra.mxu2 %v375_v18  ;;  %468 = vmatpush.msra.mxu0 %v375_v18  ;;  %v1521_v47 = vld [vmem:[%s1491_s29 + $0xb0] sm:$0xff]  ;;  %v1529_v55 = vld [vmem:[%s1491_s29 + $0x20] sm:$0xff]  ;;  %v382_v60 = vld [vmem:[#allocation5 + $0x98] sm:$0xff] }
  0x3d   : > { %1083 = vmatpush.msra.mxu3 %v407_v19  ;;  %521 = vmatpush.msra.mxu1 %v407_v19  ;;  %v449_v52 = vld [vmem:[#allocation5 + $0x2b0] sm:$0xff]  ;;  %v447_v58 = vld [vmem:[#allocation5 + $0x2a0] sm:$0xff]  ;;  %v418_v61 = vld [vmem:[#allocation5 + $0x1b8] sm:$0xff] }
  0x3e   : > { %1068 = vmatpush.msra.mxu2 %v373_v20  ;;  %469 = vmatpush.msra.mxu0 %v373_v20  ;;  %v1534_v62 = vld [vmem:[%s1491_s29 + $0xc0] sm:$0xff]  ;;  %v1537_v63 = vld [vmem:[%s1491_s29 + $0xc8] sm:$0xff]  ;;  %v445_v0 = vld [vmem:[#allocation5 + $0x290] sm:$0xff] }
  0x3f   : > { %1084 = vmatpush.msra.mxu3 %v405_v21  ;;  %522 = vmatpush.msra.mxu1 %v405_v21  ;;  %v450_v1 = vld [vmem:[#allocation5 + $0x2b8] sm:$0xff]  ;;  %v380_v2 = vld [vmem:[#allocation5 + $0x88] sm:$0xff]  ;;  %v443_v4 = vld [vmem:[#allocation5 + $0x280] sm:$0xff] }
  0x40   : > { %1069 = vmatpush.msra.mxu2 %v371_v22  ;;  %470 = vmatpush.msra.mxu0 %v371_v22  ;;  %v416_v3 = vld [vmem:[#allocation5 + $0x1a8] sm:$0xff]  ;;  %v1542_v6 = vld [vmem:[%s1491_s29 + $0x30] sm:$0xff]  ;;  %v1545_v7 = vld [vmem:[%s1491_s29 + $0x38] sm:$0xff] }
  0x41   : > { %1085 = vmatpush.msra.mxu3 %v403_v23  ;;  %523 = vmatpush.msra.mxu1 %v403_v23  ;;  %v448_v5 = vld [vmem:[#allocation5 + $0x2a8] sm:$0xff]  ;;  %v378_v8 = vld [vmem:[#allocation5 + $0x78] sm:$0xff]  ;;  %v441_v10 = vld [vmem:[#allocation5 + $0x270] sm:$0xff] }
  0x42   : > { %1070 = vmatpush.msra.mxu2 %v369_v24  ;;  %471 = vmatpush.msra.mxu0 %v369_v24  ;;  %v414_v9 = vld [vmem:[#allocation5 + $0x198] sm:$0xff]  ;;  %v376_v12 = vld [vmem:[#allocation5 + $0x68] sm:$0xff]  ;;  %v1553_v15 = vld [vmem:[%s1491_s29 + $0xe0] sm:$0xff] }
  0x43   : > { %1086 = vmatpush.msra.mxu3 %v401_v25  ;;  %524 = vmatpush.msra.mxu1 %v401_v25  ;;  %v446_v11 = vld [vmem:[#allocation5 + $0x298] sm:$0xff]  ;;  %v412_v13 = vld [vmem:[#allocation5 + $0x188] sm:$0xff]  ;;  %v439_v16 = vld [vmem:[#allocation5 + $0x260] sm:$0xff] }
  0x44   : > { %1071 = vmatpush.msra.mxu2 %v367_v26  ;;  %472 = vmatpush.msra.mxu0 %v367_v26  ;;  %v1550_v14 = vld [vmem:[%s1491_s29 + $0xd8] sm:$0xff]  ;;  %v444_v17 = vld [vmem:[#allocation5 + $0x288] sm:$0xff]  ;;  %v437_v20 = vld [vmem:[#allocation5 + $0x250] sm:$0xff] }
  0x45   : > { %1087 = vmatpush.msra.mxu3 %v399_v27  ;;  %525 = vmatpush.msra.mxu1 %v399_v27  ;;  %v374_v18 = vld [vmem:[#allocation5 + $0x58] sm:$0xff]  ;;  %v1558_v22 = vld [vmem:[%s1491_s29 + $0x48] sm:$0xff]  ;;  %v1561_v23 = vld [vmem:[%s1491_s29 + $0x50] sm:$0xff] }
  0x46   : > { %1072 = vmatpush.msra.mxu2 %v365_v28  ;;  %473 = vmatpush.msra.mxu0 %v365_v28  ;;  %v410_v19 = vld [vmem:[#allocation5 + $0x178] sm:$0xff]  ;;  %v372_v24 = vld [vmem:[#allocation5 + $0x48] sm:$0xff]  ;;  %v435_v26 = vld [vmem:[#allocation5 + $0x240] sm:$0xff] }
  0x47   : > { %1088 = vmatpush.msra.mxu3 %v397_v29  ;;  %526 = vmatpush.msra.mxu1 %v397_v29  ;;  %v442_v21 = vld [vmem:[#allocation5 + $0x278] sm:$0xff]  ;;  %v408_v25 = vld [vmem:[#allocation5 + $0x168] sm:$0xff] }
  0x48   : > { %1073 = vmatpush.msra.mxu2 %v363_v30  ;;  %474 = vmatpush.msra.mxu0 %v363_v30  ;;  %v440_v27 = vld [vmem:[#allocation5 + $0x268] sm:$0xff]  ;;  %v370_v28 = vld [vmem:[#allocation5 + $0x38] sm:$0xff]  ;;  %v1566_v30 = vld [vmem:[%s1491_s29 + $0xf0] sm:$0xff] }
  0x49   : > { %1089 = vmatpush.msra.mxu3 %v395_v31  ;;  %493 = vmatmul.f32.vlgmr.msra.gmra.mxu2 %v1502_v32  ;;  %v406_v29 = vld [vmem:[#allocation5 + $0x158] sm:$0xff] }
  0x4a   : > { %546 = vmatmul.f32.vlgmr.msra.gmra.mxu3 %v1505_v33  ;;  %565 = vmatpush.msrb.mxu2 %v457_v35  ;;  %v438_v35 = vld [vmem:[#allocation5 + $0x258] sm:$0xff] }
  0x4b   : > { %618 = vmatpush.msrb.mxu3 %v394_v34  ;;  %527 = vmatpush.msra.mxu1 %v395_v31  ;;  %v1569_v31 = vld [vmem:[%s1491_s29 + $0xf8] sm:$0xff]  ;;  %v433_v34 = vld [vmem:[#allocation5 + $0x230] sm:$0xff] }
  0x4c   : > { %566 = vmatpush.msrb.mxu2 %v455_v37  ;;  %475 = vmatmul.f32.vlgmr.msra.gmra.mxu0 %v1510_v38  ;;  %v404_v37 = vld [vmem:[#allocation5 + $0x148] sm:$0xff] }
  0x4d   : > { %619 = vmatpush.msrb.mxu3 %v392_v36  ;;  %528 = vmatmul.f32.vlgmr.msra.gmra.mxu1 %v1513_v39  ;;  %v368_v36 = vld [vmem:[#allocation5 + $0x28] sm:$0xff] }
  0x4e   : > { %671 = vmatpush.msrb.mxu0 %v426_v41  ;;  %567 = vmatpush.msrb.mxu2 %v453_v42  ;;  %v436_v41 = vld [vmem:[#allocation5 + $0x248] sm:$0xff]  ;;  %v1574_v42 = vld [vmem:[%s1491_s29 + $0x60] sm:$0xff] }
  0x4f   : > { %620 = vmatpush.msrb.mxu3 %v390_v40  ;;  %724 = vmatpush.msrb.mxu1 %v458_v43  ;;  %v431_v40 = vld [vmem:[#allocation5 + $0x220] sm:$0xff]  ;;  %v1577_v43 = vld [vmem:[%s1491_s29 + $0x68] sm:$0xff] }
  0x50   : > { %672 = vmatpush.msrb.mxu0 %v424_v45  ;;  %568 = vmatpush.msrb.mxu2 %v451_v48  ;;  %v402_v45 = vld [vmem:[#allocation5 + $0x138] sm:$0xff]  ;;  %v429_v48 = vld [vmem:[#allocation5 + $0x210] sm:$0xff] }
  0x51   : > { %621 = vmatpush.msrb.mxu3 %v388_v44  ;;  %496 = vmatmul.f32.gmra.mxu2 %v1518_v46  ;;  %v366_v44 = vld [vmem:[#allocation5 + $0x18] sm:$0xff] }
  0x52   : > { %549 = vmatmul.f32.gmra.mxu3 %v1521_v47  ;;  %725 = vmatpush.msrb.mxu1 %v456_v49  ;;  %v434_v49 = vld [vmem:[#allocation5 + $0x238] sm:$0xff] }
  0x53   : > { %622 = vmatpush.msrb.mxu3 %v386_v50  ;;  %673 = vmatpush.msrb.mxu0 %v422_v51  ;;  %v364_v50 = vld [vmem:[#allocation5 + $0x8] sm:$0xff] }
  0x54   : > { %569 = vmatpush.msrb.mxu2 %v449_v52  ;;  %726 = vmatpush.msrb.mxu1 %v454_v53  ;;  %v400_v51 = vld [vmem:[#allocation5 + $0x128] sm:$0xff]  ;;  %v1585_v53 = vld [vmem:[%s1491_s29 + $0x110] sm:$0xff] }
  0x55   : > { %478 = vmatmul.f32.gmra.mxu0 %v1526_v54  ;;  %531 = vmatmul.f32.gmra.mxu1 %v1529_v55  ;;  %v1582_v52 = vld [vmem:[%s1491_s29 + $0x108] sm:$0xff] }
  0x56   : > { %623 = vmatpush.msrb.mxu3 %v384_v56  ;;  %674 = vmatpush.msrb.mxu0 %v420_v57  ;;  %v427_v56 = vld [vmem:[#allocation5 + $0x200] sm:$0xff]  ;;  %v432_v57 = vld [vmem:[#allocation5 + $0x228] sm:$0xff] }
  0x57   : > { %570 = vmatpush.msrb.mxu2 %v447_v58  ;;  %727 = vmatpush.msrb.mxu1 %v452_v59  ;;  %v398_v58 = vld [vmem:[#allocation5 + $0x118] sm:$0xff] }
  0x58   : > { %624 = vmatpush.msrb.mxu3 %v382_v60  ;;  %675 = vmatpush.msrb.mxu0 %v418_v61  ;;  %v430_v59 = vld [vmem:[#allocation5 + $0x218] sm:$0xff]  ;;  %v343_v61 = vld [vmem:[%s1491_s29 + $0x80] sm:$0xff] }
  0x59   : > { %499 = vmatmul.f32.gmra.mxu2 %v1534_v62  ;;  %728 = vmatpush.msrb.mxu1 %v450_v1  ;;  %v342_v60 = vld [vmem:[%s1491_s29 + $0x78] sm:$0xff]  ;;  %v428_v1 = vld [vmem:[#allocation5 + $0x208] sm:$0xff] }
  0x5a   : > { %552 = vmatmul.f32.gmra.mxu3 %v1537_v63  ;;  %571 = vmatpush.msrb.mxu2 %v445_v0  ;;  %v396_v0 = vld [vmem:[#allocation5 + $0x108] sm:$0xff] }
  0x5b   : > { %625 = vmatpush.msrb.mxu3 %v380_v2  ;;  %676 = vmatpush.msrb.mxu0 %v416_v3  ;;  %v329_v2 = vld [vmem:[%s1491_s29 + $0x10] sm:$0xff]  ;;  %v332_v3 = vld [vmem:[%s1491_s29 + $0x28] sm:$0xff] }
  0x5c   : > { %572 = vmatpush.msrb.mxu2 %v443_v4  ;;  %729 = vmatpush.msrb.mxu1 %v448_v5  ;;  %v335_v4 = vld [vmem:[%s1491_s29 + $0x40] sm:$0xff]  ;;  %v350_v5 = vld [vmem:[%s1491_s29 + $0xb8] sm:$0xff] }
  0x5d   : > { %481 = vmatmul.f32.gmra.mxu0 %v1542_v6  ;;  %534 = vmatmul.f32.gmra.mxu1 %v1545_v7 }
  0x5e   : > { %626 = vmatpush.msrb.mxu3 %v378_v8  ;;  %677 = vmatpush.msrb.mxu0 %v414_v9 }
  0x5f   : > { %573 = vmatpush.msrb.mxu2 %v441_v10  ;;  %730 = vmatpush.msrb.mxu1 %v446_v11 }
  0x60   : > { %627 = vmatpush.msrb.mxu3 %v376_v12  ;;  %678 = vmatpush.msrb.mxu0 %v412_v13 }
  0x61   : > { %502 = vmatmul.f32.gmra.mxu2 %v1550_v14  ;;  %731 = vmatpush.msrb.mxu1 %v444_v17 }
  0x62   : > { %555 = vmatmul.f32.gmra.mxu3 %v1553_v15  ;;  %574 = vmatpush.msrb.mxu2 %v439_v16 }
  0x63   : > { %628 = vmatpush.msrb.mxu3 %v374_v18  ;;  %679 = vmatpush.msrb.mxu0 %v410_v19 }
  0x64   : > { %575 = vmatpush.msrb.mxu2 %v437_v20  ;;  %732 = vmatpush.msrb.mxu1 %v442_v21 }
  0x65   : > { %484 = vmatmul.f32.gmra.mxu0 %v1558_v22  ;;  %537 = vmatmul.f32.gmra.mxu1 %v1561_v23 }
  0x66   : > { %629 = vmatpush.msrb.mxu3 %v372_v24  ;;  %680 = vmatpush.msrb.mxu0 %v408_v25 }
  0x67   : > { %576 = vmatpush.msrb.mxu2 %v435_v26  ;;  %733 = vmatpush.msrb.mxu1 %v440_v27 }
  0x68   : > { %630 = vmatpush.msrb.mxu3 %v370_v28  ;;  %681 = vmatpush.msrb.mxu0 %v406_v29 }
  0x69   : > { %505 = vmatmul.f32.gmra.mxu2 %v1566_v30  ;;  %734 = vmatpush.msrb.mxu1 %v438_v35 }
  0x6a   : > { %558 = vmatmul.f32.gmra.mxu3 %v1569_v31  ;;  %577 = vmatpush.msrb.mxu2 %v433_v34 }
  0x6b   : > { %631 = vmatpush.msrb.mxu3 %v368_v36  ;;  %682 = vmatpush.msrb.mxu0 %v404_v37  ;;  %v852_v36 = vld [vmem:[#allocation7] sm:$0x3] }
  0x6c   : > { %578 = vmatpush.msrb.mxu2 %v431_v40  ;;  %735 = vmatpush.msrb.mxu1 %v436_v41 }
  0x6d   : > { %487 = vmatmul.f32.gmra.mxu0 %v1574_v42  ;;  %540 = vmatmul.f32.gmra.mxu1 %v1577_v43 }
  0x6e   : > { %632 = vmatpush.msrb.mxu3 %v366_v44  ;;  %683 = vmatpush.msrb.mxu0 %v402_v45  ;;  %v1642_v45 = vperm.slane %v852_v36, 0 }
  0x6f   : > { %579 = vmatpush.msrb.mxu2 %v429_v48  ;;  %736 = vmatpush.msrb.mxu1 %v434_v49 }
  0x70   : > { %633 = vmatpush.msrb.mxu3 %v364_v50  ;;  %684 = vmatpush.msrb.mxu0 %v400_v51  ;;  %v1644_v50 = vperm.slane %v852_v36, 1 }
  0x71   : > { %508 = vmatmul.f32.gmra.mxu2 %v1582_v52  ;;  %737 = vmatpush.msrb.mxu1 %v432_v57 }
  0x72   : > { %561 = vmatmul.f32.gmra.mxu3 %v1585_v53  ;;  %580 = vmatpush.msrb.mxu2 %v427_v56 }
  0x73   : > { %685 = vmatpush.msrb.mxu0 %v398_v58  ;;  %738 = vmatpush.msrb.mxu1 %v430_v59 }
  0x75   : > { %490 = vmatmul.f32.gmra.mxu0 %v342_v60  ;;  %543 = vmatmul.f32.gmra.mxu1 %v343_v61 }
  0x76   : > { %686 = vmatpush.msrb.mxu0 %v396_v0  ;;  %739 = vmatpush.msrb.mxu1 %v428_v1 }
  0x79   : > { %581 = vmatmul.f32.vlgmr.msrb.gmra.mxu2 %v329_v2 }
  0x7a   : > { %634 = vmatmul.f32.vlgmr.msrb.gmra.mxu3 %v1510_v38  ;;  %v338_v38 = vld [vmem:[%s1491_s29 + $0x58] sm:$0xff] }
  0x7d   : > { %687 = vmatmul.f32.vlgmr.msrb.gmra.mxu0 %v1513_v39  ;;  %740 = vmatmul.f32.vlgmr.msrb.gmra.mxu1 %v329_v2  ;;  %v341_v39 = vld [vmem:[%s1491_s29 + $0x70] sm:$0xff] }
  0x81   : > { %584 = vmatmul.f32.gmra.mxu2 %v332_v3 }
  0x82   : > { %637 = vmatmul.f32.gmra.mxu3 %v1526_v54  ;;  %v344_v54 = vld [vmem:[%s1491_s29 + $0x88] sm:$0xff] }
  0x85   : > { %690 = vmatmul.f32.gmra.mxu0 %v1529_v55  ;;  %743 = vmatmul.f32.gmra.mxu1 %v332_v3  ;;  %v347_v55 = vld [vmem:[%s1491_s29 + $0xa0] sm:$0xff] }
  0x89   : > { %587 = vmatmul.f32.gmra.mxu2 %v335_v4 }
  0x8a   : > { %640 = vmatmul.f32.gmra.mxu3 %v1542_v6  ;;  %v353_v6 = vld [vmem:[%s1491_s29 + $0xd0] sm:$0xff] }
  0x8d   : > { %693 = vmatmul.f32.gmra.mxu0 %v1545_v7  ;;  %746 = vmatmul.f32.gmra.mxu1 %v335_v4 }
  0x91   : > { %590 = vmatmul.f32.gmra.mxu2 %v338_v38 }
  0x92   : > { %643 = vmatmul.f32.gmra.mxu3 %v1558_v22 }
  0x95   : > { %696 = vmatmul.f32.gmra.mxu0 %v1561_v23  ;;  %749 = vmatmul.f32.gmra.mxu1 %v338_v38 }
  0x99   : > { %593 = vmatmul.f32.gmra.mxu2 %v341_v39 }
  0x9a   : > { %646 = vmatmul.f32.gmra.mxu3 %v1574_v42 }
  0x9d   : > { %699 = vmatmul.f32.gmra.mxu0 %v1577_v43  ;;  %752 = vmatmul.f32.gmra.mxu1 %v341_v39 }
  0xa1   : > { %596 = vmatmul.f32.gmra.mxu2 %v344_v54 }
  0xa2   : > { %649 = vmatmul.f32.gmra.mxu3 %v342_v60 }
  0xa5   : > { %702 = vmatmul.f32.gmra.mxu0 %v343_v61  ;;  %755 = vmatmul.f32.gmra.mxu1 %v344_v54 }
  0xa9   : > { %599 = vmatmul.f32.gmra.mxu2 %v347_v55 }
  0xaa   : > { %652 = vmatmul.f32.gmra.mxu3 %v1502_v32  ;;  %v356_v32 = vld [vmem:[%s1491_s29 + $0xe8] sm:$0xff] }
  0xad   : > { %705 = vmatmul.f32.gmra.mxu0 %v1505_v33  ;;  %758 = vmatmul.f32.gmra.mxu1 %v347_v55  ;;  %v359_v33 = vld [vmem:[%s1491_s29 + $0x100] sm:$0xff] }
  0xb1   : > { %602 = vmatmul.f32.gmra.mxu2 %v350_v5 }
  0xb2   : > { %655 = vmatmul.f32.gmra.mxu3 %v1518_v46 }
  0xb5   : > { %708 = vmatmul.f32.gmra.mxu0 %v1521_v47  ;;  %761 = vmatmul.f32.gmra.mxu1 %v350_v5 }
  0xb9   : > { %605 = vmatmul.f32.gmra.mxu2 %v353_v6 }
  0xba   : > { %658 = vmatmul.f32.gmra.mxu3 %v1534_v62 }
  0xbd   : > { %711 = vmatmul.f32.gmra.mxu0 %v1537_v63  ;;  %764 = vmatmul.f32.gmra.mxu1 %v353_v6  ;;  %v362_v63 = vld [vmem:[%s1491_s29 + $0x118] sm:$0xff] }
  0xc1   : > { %608 = vmatmul.f32.gmra.mxu2 %v356_v32 }
  0xc2   : > { %661 = vmatmul.f32.gmra.mxu3 %v1550_v14 }
  0xc5   : > { %714 = vmatmul.f32.gmra.mxu0 %v1553_v15  ;;  %767 = vmatmul.f32.gmra.mxu1 %v356_v32 }
  0xc9   : > { %611 = vmatmul.f32.gmra.mxu2 %v359_v33  ;;  %v476_v46 = vpop.f32.mrf.mxu0 }
  0xca   : > { %664 = vmatmul.f32.gmra.mxu3 %v1566_v30  ;;  %v529_v47 = vpop.f32.mrf.mxu1 }
  0xcb   : > { %v530_v41 = vadd.f32 %v529_v47, %v476_v46 }
  0xcc   : > { %v494_v7 = vpop.f32.mrf.mxu2 }
  0xcd   : > { %v547_v8 = vpop.f32.mrf.mxu3  ;;  %717 = vmatmul.f32.gmra.mxu0 %v1569_v31  ;;  %770 = vmatmul.f32.gmra.mxu1 %v359_v33 }
  0xce   : > { %v1621_v62 = vadd.f32 %v547_v8, %v494_v7 }
  0xd1   : > { %614 = vmatmul.f32.gmra.mxu2 %v362_v63 }
  0xd2   : > { %667 = vmatmul.f32.gmra.mxu3 %v1582_v52  ;;  %v479_v9 = vpop.f32.mrf.mxu0  ;;  %v532_v10 = vpop.f32.mrf.mxu1 }
  0xd3   : > { %v533_v56 = vadd.f32 %v532_v10, %v479_v9 }
  0xd4   : > { %v497_v11 = vpop.f32.mrf.mxu2 }
  0xd5   : > { %v550_v12 = vpop.f32.mrf.mxu3  ;;  %720 = vmatmul.f32.gmra.mxu0 %v1585_v53  ;;  %773 = vmatmul.f32.gmra.mxu1 %v362_v63 }
  0xd6   : > { %v1626_v13 = vadd.f32 %v550_v12, %v497_v11 }
  0xda   : > { %v482_v14 = vpop.f32.mrf.mxu0  ;;  %v535_v15 = vpop.f32.mrf.mxu1 }
  0xdb   : > { %v536_v4 = vadd.f32 %v535_v15, %v482_v14 }
  0xdc   : > { %v500_v16 = vpop.f32.mrf.mxu2 }
  0xdd   : > { %v553_v17 = vpop.f32.mrf.mxu3 }
  0xde   : > { %v1629_v18 = vadd.f32 %v553_v17, %v500_v16 }
  0xe2   : > { %v485_v19 = vpop.f32.mrf.mxu0  ;;  %v538_v20 = vpop.f32.mrf.mxu1 }
  0xe3   : > { %v539_v47 = vadd.f32 %v538_v20, %v485_v19 }
  0xe4   : > { %v503_v21 = vpop.f32.mrf.mxu2 }
  0xe5   : > { %v556_v22 = vpop.f32.mrf.mxu3 }
  0xe6   : > { %v1631_v23 = vadd.f32 %v556_v22, %v503_v21 }
  0xea   : > { %v488_v24 = vpop.f32.mrf.mxu0  ;;  %v541_v25 = vpop.f32.mrf.mxu1 }
  0xeb   : > { %v542_v16 = vadd.f32 %v541_v25, %v488_v24 }
  0xec   : > { %v506_v26 = vpop.f32.mrf.mxu2 }
  0xed   : > { %v559_v27 = vpop.f32.mrf.mxu3 }
  0xee   : > { %v1633_v28 = vadd.f32 %v559_v27, %v506_v26 }
  0xf2   : > { %v1635_v29 = vpop.f32.mrf.mxu0  ;;  %v1637_v30 = vpop.f32.mrf.mxu1 }
  0xf3   : > { %v545_v36 = vadd.f32 %v1637_v30, %v1635_v29 }
  0xf4   : > { %v509_v31 = vpop.f32.mrf.mxu2 }
  0xf5   : > { %v562_v34 = vpop.f32.mrf.mxu3 }
  0xf6   : > { %v1639_v35 = vadd.f32 %v562_v34, %v509_v31 }
  0xfa   : > { %v688_v37 = vpop.f32.mrf.mxu0  ;;  %v741_v40 = vpop.f32.mrf.mxu1 }
  0xfc   : > { %v582_v42 = vpop.f32.mrf.mxu2 }
  0xfd   : > { %v635_v43 = vpop.f32.mrf.mxu3  ;;  %v583_v44 = vadd.f32 %v582_v42, %v530_v41 }
  0xfe   : > { %v689_v48 = vadd.f32 %v688_v37, %v635_v43 }
  0xff   : > { %v858_v51 = vadd.f32 %v1642_v45, %v583_v44 }
 0x100   : > { %v742_v49 = vadd.f32 %v741_v40, %v689_v48 }
 0x101   : > { %882 = vst [vmem:[%s1647_s22] sm:$0xff] %v858_v51 }
 0x102   : > { %v691_v52 = vpop.f32.mrf.mxu0  ;;  %v744_v53 = vpop.f32.mrf.mxu1  ;;  %v859_v57 = vadd.f32 %v1644_v50, %v742_v49 }
 0x104   : > { %v585_v58 = vpop.f32.mrf.mxu2  ;;  %883 = vst [vmem:[%s1647_s22 + $0x8] sm:$0xff] %v859_v57 }
 0x105   : > { %v638_v59 = vpop.f32.mrf.mxu3  ;;  %v586_v60 = vadd.f32 %v585_v58, %v533_v56 }
 0x106   : > { %v692_v61 = vadd.f32 %v691_v52, %v638_v59 }
 0x107   : > { %v860_v1 = vadd.f32 %v1642_v45, %v586_v60 }
 0x108   : > { %v745_v0 = vadd.f32 %v744_v53, %v692_v61 }
 0x109   : > { %884 = vst [vmem:[%s1647_s22 + $0x10] sm:$0xff] %v860_v1 }
 0x10a   : > { %v694_v2 = vpop.f32.mrf.mxu0  ;;  %v747_v3 = vpop.f32.mrf.mxu1  ;;  %v861_v38 = vadd.f32 %v1644_v50, %v745_v0 }
 0x10c   : > { %v588_v39 = vpop.f32.mrf.mxu2  ;;  %885 = vst [vmem:[%s1647_s22 + $0x18] sm:$0xff] %v861_v38 }
 0x10d   : > { %v641_v54 = vpop.f32.mrf.mxu3  ;;  %v589_v55 = vadd.f32 %v588_v39, %v536_v4 }
 0x10e   : > { %v695_v5 = vadd.f32 %v694_v2, %v641_v54 }
 0x10f   : > { %v862_v32 = vadd.f32 %v1642_v45, %v589_v55 }
 0x110   : > { %v748_v6 = vadd.f32 %v747_v3, %v695_v5 }
 0x111   : > { %886 = vst [vmem:[%s1647_s22 + $0x20] sm:$0xff] %v862_v32 }
 0x112   : > { %v697_v33 = vpop.f32.mrf.mxu0  ;;  %v750_v46 = vpop.f32.mrf.mxu1  ;;  %v863_v7 = vadd.f32 %v1644_v50, %v748_v6 }
 0x114   : > { %v591_v8 = vpop.f32.mrf.mxu2  ;;  %887 = vst [vmem:[%s1647_s22 + $0x28] sm:$0xff] %v863_v7 }
 0x115   : > { %v644_v63 = vpop.f32.mrf.mxu3  ;;  %v592_v9 = vadd.f32 %v591_v8, %v539_v47 }
 0x116   : > { %v698_v10 = vadd.f32 %v697_v33, %v644_v63 }
 0x117   : > { %v864_v12 = vadd.f32 %v1642_v45, %v592_v9 }
 0x118   : > { %v751_v11 = vadd.f32 %v750_v46, %v698_v10 }
 0x119   : > { %888 = vst [vmem:[%s1647_s22 + $0x30] sm:$0xff] %v864_v12 }
 0x11a   : > { %v700_v14 = vpop.f32.mrf.mxu0  ;;  %v753_v15 = vpop.f32.mrf.mxu1  ;;  %v865_v17 = vadd.f32 %v1644_v50, %v751_v11 }
 0x11c   : > { %v594_v19 = vpop.f32.mrf.mxu2  ;;  %889 = vst [vmem:[%s1647_s22 + $0x38] sm:$0xff] %v865_v17 }
 0x11d   : > { %v647_v20 = vpop.f32.mrf.mxu3  ;;  %v595_v21 = vadd.f32 %v594_v19, %v542_v16 }
 0x11e   : > { %v701_v22 = vadd.f32 %v700_v14, %v647_v20 }
 0x11f   : > { %v866_v27 = vadd.f32 %v1642_v45, %v595_v21 }
 0x120   : > { %v754_v26 = vadd.f32 %v753_v15, %v701_v22 }
 0x121   : > { %890 = vst [vmem:[%s1647_s22 + $0x40] sm:$0xff] %v866_v27 }
 0x122   : > { %v703_v31 = vpop.f32.mrf.mxu0  ;;  %v756_v34 = vpop.f32.mrf.mxu1  ;;  %v867_v24 = vadd.f32 %v1644_v50, %v754_v26 }
 0x124   : > { %v597_v25 = vpop.f32.mrf.mxu2  ;;  %891 = vst [vmem:[%s1647_s22 + $0x48] sm:$0xff] %v867_v24 }
 0x125   : > { %v650_v37 = vpop.f32.mrf.mxu3  ;;  %v598_v40 = vadd.f32 %v597_v25, %v545_v36 }
 0x126   : > { %v704_v41 = vadd.f32 %v703_v31, %v650_v37 }
 0x127   : > { %v868_v43 = vadd.f32 %v1642_v45, %v598_v40 }
 0x128   : > { %v757_v42 = vadd.f32 %v756_v34, %v704_v41 }
 0x129   : > { %892 = vst [vmem:[%s1647_s22 + $0x50] sm:$0xff] %v868_v43 }
 0x12a   : > { %v706_v44 = vpop.f32.mrf.mxu0  ;;  %v759_v48 = vpop.f32.mrf.mxu1  ;;  %v869_v49 = vadd.f32 %v1644_v50, %v757_v42 }
 0x12c   : > { %v600_v29 = vpop.f32.mrf.mxu2  ;;  %893 = vst [vmem:[%s1647_s22 + $0x58] sm:$0xff] %v869_v49 }
 0x12d   : > { %v653_v30 = vpop.f32.mrf.mxu3  ;;  %v601_v51 = vadd.f32 %v600_v29, %v1621_v62 }
 0x12e   : > { %v707_v52 = vadd.f32 %v706_v44, %v653_v30 }
 0x12f   : > { %v870_v56 = vadd.f32 %v1642_v45, %v601_v51 }
 0x130   : > { %v760_v53 = vadd.f32 %v759_v48, %v707_v52 }
 0x131   : > { %894 = vst [vmem:[%s1647_s22 + $0x60] sm:$0xff] %v870_v56 }
 0x132   : > { %v709_v57 = vpop.f32.mrf.mxu0  ;;  %v762_v58 = vpop.f32.mrf.mxu1  ;;  %v871_v59 = vadd.f32 %v1644_v50, %v760_v53 }
 0x134   : > { %v603_v60 = vpop.f32.mrf.mxu2  ;;  %895 = vst [vmem:[%s1647_s22 + $0x68] sm:$0xff] %v871_v59 }
 0x135   : > { %v656_v61 = vpop.f32.mrf.mxu3  ;;  %v604_v0 = vadd.f32 %v603_v60, %v1626_v13 }
 0x136   : > { %v710_v1 = vadd.f32 %v709_v57, %v656_v61 }
 0x137   : > { %v872_v62 = vadd.f32 %v1642_v45, %v604_v0 }
 0x138   : > { %v763_v2 = vadd.f32 %v762_v58, %v710_v1 }
 0x139   : > { %896 = vst [vmem:[%s1647_s22 + $0x70] sm:$0xff] %v872_v62 }
 0x13a   : > { %v712_v3 = vpop.f32.mrf.mxu0  ;;  %v765_v4 = vpop.f32.mrf.mxu1  ;;  %v873_v38 = vadd.f32 %v1644_v50, %v763_v2 }
 0x13c   : > { %v606_v39 = vpop.f32.mrf.mxu2  ;;  %897 = vst [vmem:[%s1647_s22 + $0x78] sm:$0xff] %v873_v38 }
 0x13d   : > { %v659_v54 = vpop.f32.mrf.mxu3  ;;  %v607_v55 = vadd.f32 %v606_v39, %v1629_v18 }
 0x13e   : > { %v713_v5 = vadd.f32 %v712_v3, %v659_v54 }
 0x13f   : > { %v874_v13 = vadd.f32 %v1642_v45, %v607_v55 }
 0x140   : > { %v766_v6 = vadd.f32 %v765_v4, %v713_v5 }
 0x141   : > { %898 = vst [vmem:[%s1647_s22 + $0x80] sm:$0xff] %v874_v13 }
 0x142   : > { %v715_v32 = vpop.f32.mrf.mxu0  ;;  %v768_v33 = vpop.f32.mrf.mxu1  ;;  %v875_v46 = vadd.f32 %v1644_v50, %v766_v6 }
 0x144   : > { %v609_v47 = vpop.f32.mrf.mxu2  ;;  %899 = vst [vmem:[%s1647_s22 + $0x88] sm:$0xff] %v875_v46 }
 0x145   : > { %v662_v7 = vpop.f32.mrf.mxu3  ;;  %v610_v8 = vadd.f32 %v609_v47, %v1631_v23 }
 0x146   : > { %v716_v63 = vadd.f32 %v715_v32, %v662_v7 }
 0x147   : > { %v876_v9 = vadd.f32 %v1642_v45, %v610_v8 }
 0x148   : > { %v769_v18 = vadd.f32 %v768_v33, %v716_v63 }
 0x149   : > { %900 = vst [vmem:[%s1647_s22 + $0x90] sm:$0xff] %v876_v9 }
 0x14a   : > { %v718_v10 = vpop.f32.mrf.mxu0  ;;  %v771_v11 = vpop.f32.mrf.mxu1  ;;  %v877_v12 = vadd.f32 %v1644_v50, %v769_v18 }
 0x14c   : > { %v612_v14 = vpop.f32.mrf.mxu2  ;;  %901 = vst [vmem:[%s1647_s22 + $0x98] sm:$0xff] %v877_v12 }
 0x14d   : > { %v665_v15 = vpop.f32.mrf.mxu3  ;;  %v613_v16 = vadd.f32 %v612_v14, %v1633_v28 }
 0x14e   : > { %v719_v17 = vadd.f32 %v718_v10, %v665_v15 }
 0x14f   : > { %v878_v23 = vadd.f32 %v1642_v45, %v613_v16 }
 0x150   : > { %v772_v19 = vadd.f32 %v771_v11, %v719_v17 }
 0x151   : > { %902 = vst [vmem:[%s1647_s22 + $0xa0] sm:$0xff] %v878_v23 }
 0x152   : > { %v721_v20 = vpop.f32.mrf.mxu0  ;;  %v879_v21 = vadd.f32 %v1644_v50, %v772_v19  ;;  %v774_v22 = vpop.f32.mrf.mxu1 }
 0x154   : > { %v615_v26 = vpop.f32.mrf.mxu2  ;;  %903 = vst [vmem:[%s1647_s22 + $0xa8] sm:$0xff] %v879_v21 }
 0x155   : > { %v668_v27 = vpop.f32.mrf.mxu3  ;;  %v616_v28 = vadd.f32 %v615_v26, %v1639_v35 }
 0x156   : > { %v722_v31 = vadd.f32 %v721_v20, %v668_v27 }
 0x157   : > { %v880_v36 = vadd.f32 %v1642_v45, %v616_v28 }
 0x158   : > { %v775_v34 = vadd.f32 %v774_v22, %v722_v31 }
 0x159   : > { %904 = vst [vmem:[%s1647_s22 + $0xb0] sm:$0xff] %v880_v36 }
 0x15a   : > { %v881_v24 = vadd.f32 %v1644_v50, %v775_v34 }
 0x15c   : > { %905 = vst [vmem:[%s1647_s22 + $0xb8] sm:$0xff] %v881_v24 }
 0x15d   : > { %1302 = shalt.err (!%p1299_p0)
}
 0x15e   : > { %s1369_s11 = smov 256   ;;  %s1370_s29 = smov 16  }
 0x15f   : > { %1104 = dma.vmem_to_hbm [thread:$0]  (%p1470_p7), %s923_s15, 3072, %s925_s4, %s907_s5, %s1369_s11, %s1369_s11, %s1370_s29  }
 0x160 PF: > { %s939_s20 = sand.u32 1, %s1341_s12   ;;  %p1118_p3 = pnand %p1046_p11, %p1440_p6 }
 0x161   : > { %s940_s22 = scalar_lea.sflag [#allocation4], %s939_s20 }
 0x162   : > { %p1119_p5 = pneg %p1118_p3 }
 0x164   : > { %1336 = dma.done.wait (%p1119_p5), %s940_s22, 3072  }
 0x165   : > { %1338 = vsyncadd (%p1119_p5), %s940_s22, 4294964224  ;;  %s20_s17 = sadd.s32 1, %s1361_s17   ;;  %s1753_s12 = smov %s1345_s13 }
 0x166   : > { %p17_p9 = scmp.ge.s32.totalorder %s20_s17, 4   ;;  %s1754_s13 = smov %s1349_s14 }
 0x167   : > { %s1755_s14 = smov %s1478_s26  ;;  %s1756_s15 = smov %s1357_s16 }
 0x168   : > { %s1757_s16 = smov %s1759_s10  ;;  %19 = sbr.rel (!%p17_p9) target bundleno = 7 (0x7), region = 95 }
 0x16d   :  { %946 = vsyncpa [#allocation3], 1 }
 0x16e   :  { %948 = vsyncpa [#allocation3 + $0x1], 1 }
 0x16f   :  { %949 = vsyncpa [#allocation6], 1 }
 0x170   :  { %950 = vsyncpa [#allocation4], 1 }
 0x171   :  { %952 = vsyncpa [#allocation4 + $0x1], 1 }

</bundles_post_ra>
